<compile_context>
chip_gen: v6e
topology: v6e:2x2x1
jax: 0.10.0
libtpu: 0.0.40
codegen_flags: <defaults>
</compile_context>

<pallas_src>
import math
from functools import partial

import jax
import jax.numpy as jnp
from jax.experimental import pallas as pl
from jax.experimental.pallas import tpu as pltpu


# ----------------------------- kernel body -----------------------------


def _mat_gru_gate_kernel(w_ref, u_ref, x_ref, h_ref, b_ref, o_ref, acc_ref,
                         *, activation):
    """One (tm, tn) output tile; the K reduction runs over grid axis 2."""
    k = pl.program_id(2)

    @pl.when(k == 0)
    def _():
        # Bias-initialized accumulator: fuses the bias add into the init step.
        acc_ref[...] = b_ref[...].astype(jnp.float32)

    # Two bf16 MXU contractions (W@x and U@h) accumulate into the same f32 tile.
    acc_ref[...] += (
        jnp.dot(w_ref[...], x_ref[...], preferred_element_type=jnp.float32)
        + jnp.dot(u_ref[...], h_ref[...], preferred_element_type=jnp.float32)
    )

    @pl.when(k == pl.num_programs(2) - 1)
    def _():
        pre = acc_ref[...]
        if activation == "sigmoid":
            act = jax.nn.sigmoid(pre)
        else:  # "tanh"
            act = jnp.tanh(pre)
        o_ref[...] = act.astype(o_ref.dtype)


# ----------------------------- wrapper ---------------------------------


def _round_up(x, m):
    return ((x + m - 1) // m) * m


def _pad_and_tile(dim, align, max_tile):
    """Pad `dim` only up to `align`; tile = largest multiple of `align` that
    divides the padded dim and is <= max_tile."""
    padded = _round_up(dim, align)
    if padded <= max_tile:
        return padded, padded
    best = align
    t = max_tile - (max_tile % align)
    while t >= align:
        if padded % t == 0:
            best = t
            break
        t -= align
    return padded, best


def _largest_divisor_below(padded, tile, align):
    """Largest multiple of `align` that divides `padded` and is < tile."""
    t = tile - align
    while t >= align:
        if padded % t == 0:
            return t
        t -= align
    return tile


def _pad2(a, rows, cols):
    r, c = a.shape
    if r == rows and c == cols:
        return a
    return jnp.pad(a, ((0, rows - r), (0, cols - c)))


def _apply_act(pre, activation):
    if activation == "sigmoid":
        return jax.nn.sigmoid(pre)
    if activation == "tanh":
        return jnp.tanh(pre)
    raise ValueError(f"unsupported activation: {activation}")


def mat_gru_gate(W, U, bias, x, hidden, activation="sigmoid", *,
                 compute_dtype=jnp.bfloat16, force_pallas=False):
    """activation(W @ x + U @ hidden + bias) via a fused Pallas matmul."""
    if activation not in ("sigmoid", "tanh"):
        raise ValueError(f"unsupported activation: {activation}")

    rows, cols = bias.shape
    assert W.shape == (rows, rows) and U.shape == (rows, rows)
    assert x.shape == (rows, cols) and hidden.shape == (rows, cols)

    # Sub-(8,128) problems: lane padding + launch overhead dominate -> XLA.
    if not force_pallas and (rows < 8 or cols < 128):
        pre = (W.astype(jnp.float32) @ x.astype(jnp.float32)
               + U.astype(jnp.float32) @ hidden.astype(jnp.float32)
               + bias.astype(jnp.float32))
        return _apply_act(pre, activation).astype(x.dtype)

    M, K, N = rows, rows, cols

    # Padding / tiling:
    #   M: sublane axis  -> multiple of 8,   tile <= 512
    #   N: lane axis     -> multiple of 128, tile <= 512 (lane-dense stores)
    #   K: single tile if it fits (8-aligned), else 128-aligned & tiled
    MAX_TM, MAX_TN, MAX_TK = 512, 512, 512
    Mp, tm = _pad_and_tile(M, 8, MAX_TM)
    Np, tn = _pad_and_tile(N, 128, MAX_TN)
    K8 = _round_up(K, 8)
    if K8 <= MAX_TK:
        Kp, tk = K8, K8
    else:
        Kp, tk = _pad_and_tile(K, 128, MAX_TK)

    # Megacore: make sure a non-trivial problem exposes >= 2 parallel blocks
    # so both v7x TensorCores get work (cheap on 1-TC chips).
    if (Mp // tm) * (Np // tn) == 1 and Mp * Np >= 2 * 128 * 128:
        new_tn = _largest_divisor_below(Np, tn, 128)
        if new_tn < tn:
            tn = new_tn
        else:
            new_tm = _largest_divisor_below(Mp, tm, 8)
            if new_tm < tm:
                tm = new_tm

    grid = (Mp // tm, Np // tn, Kp // tk)

    # bf16 operands for the MXU (f32 accumulation in-kernel); bias stays f32.
    W_p = _pad2(W, Mp, Kp).astype(compute_dtype)
    U_p = _pad2(U, Mp, Kp).astype(compute_dtype)
    X_p = _pad2(x, Kp, Np).astype(compute_dtype)       # zero K-pad contributes 0
    H_p = _pad2(hidden, Kp, Np).astype(compute_dtype)
    B_p = _pad2(bias, Mp, Np).astype(jnp.float32)

    out_p = pl.pallas_call(
        partial(_mat_gru_gate_kernel, activation=activation),
        out_shape=jax.ShapeDtypeStruct((Mp, Np), x.dtype),
        grid_spec=pltpu.PrefetchScalarGridSpec(
            num_scalar_prefetch=0,
            grid=grid,
            in_specs=[
                pl.BlockSpec((tm, tk), lambda i, j, k: (i, k)),   # W
                pl.BlockSpec((tm, tk), lambda i, j, k: (i, k)),   # U
                pl.BlockSpec((tk, tn), lambda i, j, k: (k, j)),   # x
                pl.BlockSpec((tk, tn), lambda i, j, k: (k, j)),   # hidden
                pl.BlockSpec((tm, tn), lambda i, j, k: (i, j)),   # bias (k-invariant)
            ],
            out_specs=pl.BlockSpec((tm, tn), lambda i, j, k: (i, j)),
            scratch_shapes=[pltpu.VMEM((tm, tn), jnp.float32)],
        ),
        compiler_params=pltpu.CompilerParams(
            dimension_semantics=("parallel", "parallel", "arbitrary"),
        ),
    )(W_p, U_p, X_p, H_p, B_p)

    return out_p[:M, :N]


# ----------------------------- init / reference -------------------------


def init_params(key, rows, cols, dtype=jnp.float32):
    # Mirrors reset_param: uniform(-stdv, stdv), stdv = 1/sqrt(t.size(1)) = 1/sqrt(rows)
    stdv = 1.0 / math.sqrt(rows)
    kw, ku = jax.random.split(key)
    W = jax.random.uniform(kw, (rows, rows), dtype, minval=-stdv, maxval=stdv)
    U = jax.random.uniform(ku, (rows, rows), dtype, minval=-stdv, maxval=stdv)
    bias = jnp.zeros((rows, cols), dtype)
    return W, U, bias


def _reference(W, U, bias, x, hidden, activation, op_dtype=jnp.float32):
    pre = (jnp.dot(W.astype(op_dtype), x.astype(op_dtype),
                   preferred_element_type=jnp.float32)
           + jnp.dot(U.astype(op_dtype), hidden.astype(op_dtype),
                     preferred_element_type=jnp.float32)
           + bias.astype(jnp.float32))
    return _apply_act(pre, activation).astype(x.dtype)


# ----------------------------- demo -------------------------------------


if __name__ == "__main__":
    key = jax.random.PRNGKey(0)

    # --- small shapes matching the module's typical use (padding path) ---
    rows, cols = 32, 16
    kp, kx, kh, k2 = jax.random.split(key, 4)
    W, U, bias = init_params(kp, rows, cols)
    x = jax.random.normal(kx, (rows, cols), jnp.float32)
    hidden = jax.random.normal(kh, (rows, cols), jnp.float32)

    out = jax.block_until_ready(
        mat_gru_gate(W, U, bias, x, hidden, "sigmoid", force_pallas=True))
    ref_f32 = _reference(W, U, bias, x, hidden, "sigmoid", jnp.float32)
    ref_bf16 = _reference(W, U, bias, x, hidden, "sigmoid", jnp.bfloat16)
    assert out.shape == (rows, cols)
    assert jnp.allclose(out, ref_bf16, atol=5e-3, rtol=0)   # precision-matched
    assert jnp.allclose(out, ref_f32, atol=2.5e-2, rtol=0)  # vs f32 spec

    # --- larger, non-power-of-two shapes (tight padding + megacore split) ---
    R2, C2 = 200, 384
    ka, kb, kc = jax.random.split(k2, 3)
    W2, U2, bias2 = init_params(ka, R2, C2)
    x2 = jax.random.normal(kb, (R2, C2), jnp.float32)
    h2 = jax.random.normal(kc, (R2, C2), jnp.float32)

    out2 = jax.block_until_ready(mat_gru_gate(W2, U2, bias2, x2, h2, "tanh"))
    ref2_f32 = _reference(W2, U2, bias2, x2, h2, "tanh", jnp.float32)
    ref2_bf16 = _reference(W2, U2, bias2, x2, h2, "tanh", jnp.bfloat16)
    assert out2.shape == (R2, C2)
    assert jnp.allclose(out2, ref2_bf16, atol=5e-3, rtol=0)
    assert jnp.allclose(out2, ref2_f32, atol=2.5e-2, rtol=0)

    print("KERNEL_OK")
</pallas_src>

<mosaic_0001>
module attributes {stable_mosaic.version = 11 : i64} {
  func.func @_mat_gru_gate_kernel(%arg0: i32, %arg1: i32, %arg2: i32, %arg3: memref<32x32xbf16, #tpu.memory_space<vmem>>, %arg4: memref<32x32xbf16, #tpu.memory_space<vmem>>, %arg5: memref<32x128xbf16, #tpu.memory_space<vmem>>, %arg6: memref<32x128xbf16, #tpu.memory_space<vmem>>, %arg7: memref<32x128xf32, #tpu.memory_space<vmem>>, %arg8: memref<32x128xf32, #tpu.memory_space<vmem>>, %arg9: memref<32x128xf32, #tpu.memory_space<vmem>>) attributes {dimension_semantics = [#tpu.dimension_semantics<parallel>, #tpu.dimension_semantics<parallel>, #tpu.dimension_semantics<arbitrary>], iteration_bounds = array<i64: 1, 1, 1>, scalar_prefetch = 0 : i64, scratch_operands = 1 : i64, tpu.core_type = #tpu.core_type<tc>, window_params = [{transform_indices = @transform_0, window_bounds = array<i64: 32, 32>}, {transform_indices = @transform_1, window_bounds = array<i64: 32, 32>}, {transform_indices = @transform_2, window_bounds = array<i64: 32, 128>}, {transform_indices = @transform_3, window_bounds = array<i64: 32, 128>}, {transform_indices = @transform_4, window_bounds = array<i64: 32, 128>}, {transform_indices = @transform_5, window_bounds = array<i64: 32, 128>}]} {
    %c0_i32 = arith.constant 0 : i32
    %0 = arith.cmpi eq, %arg2, %c0_i32 : i32
    %1 = arith.extui %0 : i1 to i32
    %c0_i32_0 = arith.constant 0 : i32
    %2 = arith.cmpi ne, %1, %c0_i32_0 : i32
    scf.if %2 {
      %c0_15 = arith.constant 0 : index
      %c0_16 = arith.constant 0 : index
      %16 = vector.load %arg7[%c0_15, %c0_16] : memref<32x128xf32, #tpu.memory_space<vmem>>, vector<32x128xf32>
      %c0_17 = arith.constant 0 : index
      %c0_18 = arith.constant 0 : index
      %17 = vector.load %arg9[%c0_17, %c0_18] : memref<32x128xf32, #tpu.memory_space<vmem>>, vector<32x128xf32>
      tpu.vector_store %arg9[%c0_17, %c0_18], %16 {strides = array<i32>} : memref<32x128xf32, #tpu.memory_space<vmem>>, vector<32x128xf32>,
    } else {
    }
    %c0 = arith.constant 0 : index
    %c0_1 = arith.constant 0 : index
    %3 = vector.load %arg9[%c0, %c0_1] : memref<32x128xf32, #tpu.memory_space<vmem>>, vector<32x128xf32>
    %c0_2 = arith.constant 0 : index
    %c0_3 = arith.constant 0 : index
    %4 = vector.load %arg3[%c0_2, %c0_3] : memref<32x32xbf16, #tpu.memory_space<vmem>>, vector<32x32xbf16>
    %c0_4 = arith.constant 0 : index
    %c0_5 = arith.constant 0 : index
    %5 = vector.load %arg5[%c0_4, %c0_5] : memref<32x128xbf16, #tpu.memory_space<vmem>>, vector<32x128xbf16>
    %cst = arith.constant dense<0.000000e+00> : vector<32x128xf32>
    %6 = tpu.matmul %4, %5, %cst {dimension_numbers = #tpu.dot_dimension_numbers<[1], [0], [0], [1], [0, 0, 1, 1], [], []>} : vector<32x32xbf16>, vector<32x128xbf16>, vector<32x128xf32> -> vector<32x128xf32>
    %c0_6 = arith.constant 0 : index
    %c0_7 = arith.constant 0 : index
    %7 = vector.load %arg4[%c0_6, %c0_7] : memref<32x32xbf16, #tpu.memory_space<vmem>>, vector<32x32xbf16>
    %c0_8 = arith.constant 0 : index
    %c0_9 = arith.constant 0 : index
    %8 = vector.load %arg6[%c0_8, %c0_9] : memref<32x128xbf16, #tpu.memory_space<vmem>>, vector<32x128xbf16>
    %cst_10 = arith.constant dense<0.000000e+00> : vector<32x128xf32>
    %9 = tpu.matmul %7, %8, %cst_10 {dimension_numbers = #tpu.dot_dimension_numbers<[1], [0], [0], [1], [0, 0, 1, 1], [], []>} : vector<32x32xbf16>, vector<32x128xbf16>, vector<32x128xf32> -> vector<32x128xf32>
    %10 = arith.addf %6, %9 : vector<32x128xf32>
    %11 = arith.addf %3, %10 : vector<32x128xf32>
    %c0_11 = arith.constant 0 : index
    %c0_12 = arith.constant 0 : index
    %12 = vector.load %arg9[%c0_11, %c0_12] : memref<32x128xf32, #tpu.memory_space<vmem>>, vector<32x128xf32>
    tpu.vector_store %arg9[%c0_11, %c0_12], %11 {strides = array<i32>} : memref<32x128xf32, #tpu.memory_space<vmem>>, vector<32x128xf32>,
    %c0_i32_13 = arith.constant 0 : i32
    %13 = arith.cmpi eq, %arg2, %c0_i32_13 : i32
    %14 = arith.extui %13 : i1 to i32
    %c0_i32_14 = arith.constant 0 : i32
    %15 = arith.cmpi ne, %14, %c0_i32_14 : i32
    scf.if %15 {
      %c0_15 = arith.constant 0 : index
      %c0_16 = arith.constant 0 : index
      %16 = vector.load %arg9[%c0_15, %c0_16] : memref<32x128xf32, #tpu.memory_space<vmem>>, vector<32x128xf32>
      %17 = arith.negf %16 : vector<32x128xf32>
      %18 = math.exp %17 : vector<32x128xf32>
      %cst_17 = arith.constant 1.000000e+00 : f32
      %19 = vector.broadcast %cst_17 : f32 to vector<32x128xf32>
      %20 = arith.addf %19, %18 : vector<32x128xf32>
      %21 = arith.divf %19, %20 : vector<32x128xf32>
      %c0_18 = arith.constant 0 : index
      %c0_19 = arith.constant 0 : index
      %22 = vector.load %arg8[%c0_18, %c0_19] : memref<32x128xf32, #tpu.memory_space<vmem>>, vector<32x128xf32>
      tpu.vector_store %arg8[%c0_18, %c0_19], %21 {strides = array<i32>} : memref<32x128xf32, #tpu.memory_space<vmem>>, vector<32x128xf32>,
    } else {
    }
    return
  }
  func.func @transform_0(%arg0: i32, %arg1: i32, %arg2: i32) -> (i32, i32) {
    %c0_i32 = arith.constant 0 : i32
    return %arg0, %arg2 : i32, i32
  }
  func.func @transform_1(%arg0: i32, %arg1: i32, %arg2: i32) -> (i32, i32) {
    %c0_i32 = arith.constant 0 : i32
    return %arg0, %arg2 : i32, i32
  }
  func.func @transform_2(%arg0: i32, %arg1: i32, %arg2: i32) -> (i32, i32) {
    %c0_i32 = arith.constant 0 : i32
    return %arg2, %arg1 : i32, i32
  }
  func.func @transform_3(%arg0: i32, %arg1: i32, %arg2: i32) -> (i32, i32) {
    %c0_i32 = arith.constant 0 : i32
    return %arg2, %arg1 : i32, i32
  }
  func.func @transform_4(%arg0: i32, %arg1: i32, %arg2: i32) -> (i32, i32) {
    %c0_i32 = arith.constant 0 : i32
    return %arg0, %arg1 : i32, i32
  }
  func.func @transform_5(%arg0: i32, %arg1: i32, %arg2: i32) -> (i32, i32) {
    %c0_i32 = arith.constant 0 : i32
    return %arg0, %arg1 : i32, i32
  }
}

</mosaic_0001>

<bundles_post_ra>
// kernel: tpu_custom_call.1
= control target key start
LH: loop header
LB: loop body
LE: loop exit
PB: predicated region body
PF: predicated region fallthrough
CT: control target
= control target key end

     0   :  { %10 = vsyncpa [#allocation4], 0  ;;  %s617_s0 = inlined_call_operand.hbm [shape: bf16[32,32], index: 0, kind: input, shape index: {}]   ;;  %s618_s1 = inlined_call_operand.hbm [shape: bf16[32,32], index: 1, kind: input, shape index: {}]   ;;  %s619_s2 = inlined_call_operand.hbm [shape: bf16[32,128], index: 2, kind: input, shape index: {}]   ;;  %s620_s3 = inlined_call_operand.hbm [shape: bf16[32,128], index: 3, kind: input, shape index: {}]   ;;  %s621_s4 = inlined_call_operand.hbm [shape: f32[32,128], index: 4, kind: input, shape index: {}]   ;;  %s622_s5 = inlined_call_operand.hbm [shape: f32[32,128], index: 5, kind: output, shape index: {}]  }
   0x1   :  { %11 = vsyncpa [#allocation7], 0 }
   0x2   :  { %12 = vsyncpa [#allocation10], 0 }
   0x3   :  { %13 = vsyncpa [#allocation5], 0  ;;  %s541_s18 = smov [#allocation6]   ;;  %s542_s20 = smov [#allocation9]  }
   0x4   :  { %s31_s19 = sshll.u32 %s541_s18, 4  ;;  %s55_s21 = sshll.u32 %s542_s20, 4  ;;  %s32_s19 = int_to_ptr.vmem [resolvable:$true] %s31_s19  ;;  %s56_s21 = int_to_ptr.vmem [resolvable:$true] %s55_s21 }
   0x5   :  { %s421_s22 = scalar_lea.vmem %s32_s19, 256  ;;  %p426_p1 = scmp.lt.s32.totalorder %s32_s19, %s32_s19 }
   0x6   :  { %p422_p0 = scmp.ne.s32.totalorder %s32_s19, %s421_s22  ;;  %p427_p2 = scmp.lt.s32.totalorder %s421_s22, %s421_s22 }
   0x8   :  { %p428_p3 = por %p427_p2, %p426_p1 }
   0xa   :  { %p429_p4 = pnand %p428_p3, %p422_p0 }
   0xc   :  { %432 = shalt.err (!%p429_p4)
}
   0xd   :  { %s543_s23 = smov 64   ;;  %s544_s24 = smov 4  }
   0xe   :  { %37 = dma.hbm_to_vmem [thread:$0]  %s618_s1, 256, %s32_s19, [#allocation7], %s543_s23, %s543_s23, %s544_s24  }
   0xf   :  { %s441_s27 = scalar_lea.vmem %s56_s21, 256  ;;  %p446_p6 = scmp.lt.s32.totalorder %s56_s21, %s56_s21 }
  0x10   :  { %p442_p5 = scmp.ne.s32.totalorder %s56_s21, %s441_s27  ;;  %p447_p7 = scmp.lt.s32.totalorder %s441_s27, %s441_s27 }
  0x12   :  { %p448_p8 = por %p447_p7, %p446_p6 }
  0x14   :  { %p449_p9 = pnand %p448_p8, %p442_p5 }
  0x16   :  { %452 = shalt.err (!%p449_p9)
}
  0x17   :  { %61 = dma.hbm_to_vmem [thread:$0]  %s620_s3, 256, %s56_s21, [#allocation10], %s543_s23, %s543_s23, %s544_s24  }
  0x18   :  { %s545_s30 = smov [#allocation3]   ;;  %s546_s7 = smov [#allocation8]  }
  0x19   :  { %s19_s6 = sshll.u32 %s545_s30, 4  ;;  %s43_s8 = sshll.u32 %s546_s7, 4  ;;  %s20_s6 = int_to_ptr.vmem [resolvable:$true] %s19_s6  ;;  %s44_s8 = int_to_ptr.vmem [resolvable:$true] %s43_s8 }
  0x1a   :  { %s461_s1 = scalar_lea.vmem %s20_s6, 256  ;;  %p466_p11 = scmp.lt.s32.totalorder %s20_s6, %s20_s6 }
  0x1b   :  { %p462_p10 = scmp.ne.s32.totalorder %s20_s6, %s461_s1  ;;  %p467_p12 = scmp.lt.s32.totalorder %s461_s1, %s461_s1 }
  0x1d   :  { %p468_p13 = por %p467_p12, %p466_p11 }
  0x1f   :  { %p469_p0 = pnand %p468_p13, %p462_p10 }
  0x21   :  { %472 = shalt.err (!%p469_p0)
}
  0x22   :  { %25 = dma.hbm_to_vmem [thread:$0]  %s617_s0, 256, %s20_s6, [#allocation4], %s543_s23, %s543_s23, %s544_s24  }
  0x23   :  { %s481_s3 = scalar_lea.vmem %s44_s8, 256  ;;  %p486_p2 = scmp.lt.s32.totalorder %s44_s8, %s44_s8 }
  0x24   :  { %p482_p1 = scmp.ne.s32.totalorder %s44_s8, %s481_s3  ;;  %p487_p3 = scmp.lt.s32.totalorder %s481_s3, %s481_s3 }
  0x26   :  { %p488_p4 = por %p487_p3, %p486_p2 }
  0x28   :  { %p489_p5 = pnand %p488_p4, %p482_p1 }
  0x2a   :  { %492 = shalt.err (!%p489_p5)
}
  0x2b   :  { %49 = dma.hbm_to_vmem [thread:$0]  %s619_s2, 256, %s44_s8, [#allocation7], %s543_s23, %s543_s23, %s544_s24  }
  0x2c   :  { %s547_s13 = smov [#allocation11]  }
  0x2d   :  { %s67_s14 = sshll.u32 %s547_s13, 4  ;;  %s68_s14 = int_to_ptr.vmem [resolvable:$true] %s67_s14 }
  0x2e   :  { %s501_s15 = scalar_lea.vmem %s68_s14, 512  ;;  %p506_p7 = scmp.lt.s32.totalorder %s68_s14, %s68_s14 }
  0x2f   :  { %p502_p6 = scmp.ne.s32.totalorder %s68_s14, %s501_s15  ;;  %p507_p8 = scmp.lt.s32.totalorder %s501_s15, %s501_s15 }
  0x31   :  { %p508_p9 = por %p507_p8, %p506_p7 }
  0x33   :  { %p509_p10 = pnand %p508_p9, %p502_p6 }
  0x35   :  { %512 = shalt.err (!%p509_p10)
}
  0x36   :  { %s548_s0 = smov 128   ;;  %s549_s16 = smov 8  }
  0x37   :  { %73 = dma.hbm_to_vmem [thread:$0]  %s621_s4, 512, %s68_s14, [#allocation10], %s548_s0, %s548_s0, %s549_s16  }
  0x38   :  { %533 = dma.done.wait [#allocation4], 256  }
  0x39   :  { %534 = vsyncadd [#allocation4], 4294967040 }
  0x3a   :  { %535 = dma.done.wait [#allocation7], 512  }
  0x3b   :  { %536 = vsyncadd [#allocation7], 4294966784 }
  0x3c   :  { %537 = dma.done.wait [#allocation10], 768  }
  0x3d   :  { %538 = vsyncadd [#allocation10], 4294966528  ;;  %v389_v0 = vld [vmem:[#allocation9 + $0x8] sm:$0xff]   ;;  %v390_v1 = vld [vmem:[#allocation8 + $0x8] sm:$0xff]   ;;  %vm144_vm0 = vcmask 261120   ;;  %s550_s2 = smov [#allocation12]  }
  0x3e   :  { %363 = vmatprep.subr.bf16.mxu0 %v389_v0  ;;  %v391_v2 = vld [vmem:[#allocation9] sm:$0xff]   ;;  %371 = vmatprep.subr.bf16.mxu1 %v390_v1  ;;  %v392_v3 = vld [vmem:[#allocation8] sm:$0xff]   ;;  %v395_v6 = vld [vmem:[#allocation6 + $0x8] sm:$0xff]   ;;  %s325_s4 = sshll.u32 %s550_s2, 4  ;;  %s326_s4 = int_to_ptr.vmem [resolvable:$true] %s325_s4 }
  0x3f   :  { %364 = vmatpush3.bf16.msra.mxu0 %v389_v0  ;;  %372 = vmatpush3.bf16.msra.mxu1 %v390_v1  ;;  %v393_v4 = vld [vmem:[#allocation6] sm:$0xff]   ;;  %v394_v5 = vld [vmem:[#allocation3] sm:$0xff]   ;;  %v396_v7 = vld [vmem:[#allocation3 + $0x8] sm:$0xff]   ;;  %s513_s19 = scalar_lea.vmem %s326_s4, 512  ;;  %p518_p12 = scmp.lt.s32.totalorder %s326_s4, %s326_s4 }
  0x40   :  { %365 = vmatprep.subr.bf16.mxu0 %v391_v2  ;;  %373 = vmatprep.subr.bf16.mxu1 %v392_v3  ;;  %v96_v9 = vld [vmem:[#allocation11 + $0x10] sm:$0xff]  ;;  %v94_v13 = vld [vmem:[#allocation11] sm:$0xff]  ;;  %v97_v18 = vld [vmem:[#allocation11 + $0x18] sm:$0xff]  ;;  %p514_p11 = scmp.ne.s32.totalorder %s326_s4, %s513_s19  ;;  %p519_p13 = scmp.lt.s32.totalorder %s513_s19, %s513_s19 }
  0x41   :  { %367 = vmatprep.mubr.msk.bf16.mxu0 %vm144_vm0, %v393_v4  ;;  %375 = vmatprep.mubr.msk.bf16.mxu1 %vm144_vm0, %v394_v5  ;;  %v95_v24 = vld [vmem:[#allocation11 + $0x8] sm:$0xff] }
  0x42   :  { %p520_p0 = por %p519_p13, %p518_p12 }
  0x43   :  { %366 = vmatpush3.bf16.msra.mxu0 %v391_v2  ;;  %374 = vmatpush3.bf16.msra.mxu1 %v392_v3 }
  0x44   :  { %p521_p1 = pnand %p520_p0, %p514_p11 }
  0x46   :  { %368 = vmatmul.mubr.msk.bf16.vlgmr.msra.gmra.mxu0 %vm144_vm0, %v395_v6  ;;  %376 = vmatmul.mubr.msk.bf16.vlgmr.msra.gmra.mxu1 %vm144_vm0, %v396_v7 }
 0x106   :  { %v369_v8 = vpop.f32.mrf.mxu0  ;;  %v377_v10 = vpop.f32.mrf.mxu1 }
 0x107   :  { %v271_v11 = vadd.f32 %v377_v10, %v369_v8 }
 0x108   :  { %v185_v12 = vpop.f32.mrf.mxu0  ;;  %v262_v14 = vpop.f32.mrf.mxu1 }
 0x109   :  { %v279_v15 = vadd.f32 %v271_v11, %v96_v9  ;;  %v263_v16 = vadd.f32 %v262_v14, %v185_v12 }
 0x10a   :  { %v370_v17 = vpop.f32.mrf.mxu0  ;;  %v378_v19 = vpop.f32.mrf.mxu1 }
 0x10b   :  { %v353_v20 = vmul.f32 -1.442695, %v279_v15  ;;  %v277_v21 = vadd.f32 %v263_v16, %v94_v13  ;;  %v274_v22 = vadd.f32 %v378_v19, %v370_v17 }
 0x10c   :  { %v188_v23 = vpop.f32.mrf.mxu0  ;;  %v265_v25 = vpop.f32.mrf.mxu1 }
 0x10d   :  { %397 = vpow2.f32 %v353_v20  ;;  %v351_v26 = vmul.f32 -1.442695, %v277_v21  ;;  %v280_v27 = vadd.f32 %v274_v22, %v97_v18  ;;  %v266_v28 = vadd.f32 %v265_v25, %v188_v23 }
 0x10f   :  { %399 = vpow2.f32 %v351_v26  ;;  %v354_v29 = vmul.f32 -1.442695, %v280_v27  ;;  %v278_v30 = vadd.f32 %v266_v28, %v95_v24 }
 0x111   :  { %401 = vpow2.f32 %v354_v29  ;;  %v352_v31 = vmul.f32 -1.442695, %v278_v30 }
 0x113   :  { %403 = vpow2.f32 %v352_v31 }
 0x11a   :  { %v398_v32 = vpop.eup %397 }
 0x11b   :  { %v306_v33 = vadd.f32 1.0, %v398_v32 }
 0x11c   :  { %v400_v34 = vpop.eup %399 }
 0x11d   :  { %405 = vrcp.f32 %v306_v33  ;;  %v304_v35 = vadd.f32 1.0, %v400_v34 }
 0x11e   :  { %v402_v36 = vpop.eup %401 }
 0x11f   :  { %407 = vrcp.f32 %v304_v35  ;;  %v307_v37 = vadd.f32 1.0, %v402_v36 }
 0x120   :  { %v404_v38 = vpop.eup %403 }
 0x121   :  { %409 = vrcp.f32 %v307_v37  ;;  %v305_v39 = vadd.f32 1.0, %v404_v38 }
 0x123   :  { %411 = vrcp.f32 %v305_v39 }
 0x12a   :  { %v406_v40 = vpop.eup %405 }
 0x12b   :  { %318 = vst [vmem:[#allocation12 + $0x10] sm:$0xff] %v406_v40 }
 0x12c   :  { %v408_v41 = vpop.eup %407 }
 0x12d   :  { %316 = vst [vmem:[#allocation12] sm:$0xff] %v408_v41 }
 0x12e   :  { %v410_v42 = vpop.eup %409 }
 0x12f   :  { %319 = vst [vmem:[#allocation12 + $0x18] sm:$0xff] %v410_v42 }
 0x130   :  { %v412_v43 = vpop.eup %411 }
 0x131   :  { %317 = vst [vmem:[#allocation12 + $0x8] sm:$0xff] %v412_v43 }
 0x132   :  { %524 = shalt.err (!%p521_p1)
}
 0x133   :  { %331 = dma.vmem_to_hbm [thread:$0]  %s326_s4, 512, %s622_s5, [#allocation5], %s548_s0, %s548_s0, %s549_s16  }
 0x134   :  { %539 = dma.done.wait [#allocation5], 512  }
 0x135   :  { %540 = vsyncadd [#allocation5], 4294966784 }
 0x136   :  { %335 = vsyncpa [#allocation4], 1 }
 0x137   :  { %336 = vsyncpa [#allocation7], 1 }
 0x138   :  { %337 = vsyncpa [#allocation10], 1 }
 0x139   :  { %338 = vsyncpa [#allocation5], 1 }

</bundles_post_ra>
